<compile_context>
chip_gen: v7x
topology: tpu7x:2x2x1
jax: 0.10.0
libtpu: 0.0.40
codegen_flags: <defaults>
</compile_context>

<pallas_src>
import jax
import jax.numpy as jnp
import numpy as np
from jax.experimental import pallas as pl
from jax.experimental.pallas import tpu as pltpu

EPS = 1e-5
_VPU_POINTWISE_MAX_C = 16   # contraction sizes up to this use exact f32 VPU FMAs


def _round_up(v, m):
    return ((v + m - 1) // m) * m


def _choose_lane_tile(l_pad, batch, c_in, c_out, budget_bytes=24 * 1024 * 1024):
    """Largest lane tile (multiple of 128 dividing l_pad) whose per-generation
    VMEM footprint (double-buffered x/out blocks + resident params + halo table)
    fits the budget; prefers >= 2 total tiles so the DMA pipeline overlaps."""
    total = batch * l_pad
    cands = [t for t in (2048, 1024, 512, 256, 128) if l_pad % t == 0] or [l_pad]
    c8, co8 = _round_up(c_in, 8), _round_up(c_out, 8)

    def est(lt):
        n_tiles = total // lt
        x_blk = 2 * c8 * lt * 4                      # double-buffered input block
        o_blk = 2 * co8 * lt * 4                     # double-buffered output block
        edges = n_tiles * c8 * 128 * 4               # resident halo table (lane-padded)
        params = 2 * (c8 * 128 + co8 * _round_up(c_in, 128) + 2 * co8 * 128) * 4
        scratch = 4 * co8 * 128 * 4                  # BN sum / sumsq / scale / shift
        return x_blk + o_blk + edges + params + scratch

    for t in cands:
        if est(t) <= budget_bytes and total // t >= 2:
            return t, est(t)
    for t in cands:
        if est(t) <= budget_bytes:
            return t, est(t)
    return cands[-1], est(cands[-1])


@jax.jit
def separable_conv2d(x, dw_w, dw_b, pw_w, pw_b, gamma, beta):
    B, C, H, W = x.shape
    L = H * W
    Cout = pw_w.shape[0]

    # ---- pad L to a lane-dense multiple of 128 (padded cols masked from BN
    #      stats and trimmed from the output; x padding is zero, so the k=3
    #      zero-pad semantics at the real sequence end are preserved) ----
    Lp = _round_up(L, 128)
    x3 = x.reshape(B, C, L).astype(jnp.float32)
    if Lp != L:
        x3 = jnp.pad(x3, ((0, 0), (0, 0), (0, Lp - L)))

    # fold batch onto the lane axis: rows = channels, lanes = (B, Lp)
    x_cbl = jnp.transpose(x3, (1, 0, 2))                     # (C, B, Lp)
    x2 = x_cbl.reshape(C, B * Lp)

    Lt, est_bytes = _choose_lane_tile(Lp, B, C, Cout)
    n_seg = Lp // Lt                                          # tiles per batch segment
    n_tiles = B * n_seg

    # ---- parameter packing (tiny plain-JAX glue) ----
    taps = dw_w.reshape(C, 3).astype(jnp.float32)
    dwp = jnp.concatenate([taps, dw_b.reshape(C, 1).astype(jnp.float32)], axis=1)  # (C,4)
    pww = pw_w.reshape(Cout, C).astype(jnp.float32)           # (Cout, C)  -- B-linear
    pwb = pw_b.reshape(Cout, 1).astype(jnp.float32)
    gb = jnp.stack([gamma.astype(jnp.float32), beta.astype(jnp.float32)], axis=1)  # (Cout,2)

    # ---- per-tile halo columns for the depthwise k=3 conv; zero at every
    #      batch-segment edge (no cross-batch / cross-tile leakage) ----
    zc = jnp.zeros((C, B, 1), jnp.float32)
    left = jnp.concatenate([zc, x_cbl[:, :, Lt - 1:Lp - 1:Lt]], axis=2)     # (C,B,n_seg)
    right = jnp.concatenate([x_cbl[:, :, Lt:Lp:Lt], zc], axis=2)            # (C,B,n_seg)
    edges = jnp.stack([left.reshape(C, n_tiles), right.reshape(C, n_tiles)], axis=-1)
    edges = jnp.transpose(edges, (1, 0, 2))                                 # (nT, C, 2)

    inv_n = 1.0 / float(B * L)        # BN count excludes padded columns
    padded = Lp != L

    def kernel(x_ref, dwp_ref, edges_ref, w_ref, pwb_ref, gb_ref, o_ref,
               sum_ref, ssq_ref, scale_ref, shift_ref):
        p = pl.program_id(0)          # 0: statistics pass, 1: normalize + ReLU pass
        li = pl.program_id(1)         # lane-tile index over (B, Lp)

        x_t = x_ref[...]                                      # (C, Lt)
        taps_t = dwp_ref[...]                                 # (C, 4)
        w0, w1 = taps_t[:, 0:1], taps_t[:, 1:2]
        w2, db = taps_t[:, 2:3], taps_t[:, 3:4]

        halo = edges_ref[li]                                  # (C, 2) from resident table
        h_left, h_right = halo[:, 0:1], halo[:, 1:2]

        # depthwise k=3: two XLU rolls + fix only the two edge lane columns
        lane = jax.lax.broadcasted_iota(jnp.int32, (1, Lt), 1)
        x_lm1 = jnp.where(lane == 0, h_left, pltpu.roll(x_t, 1, 1))          # x[l-1]
        x_lp1 = jnp.where(lane == Lt - 1, h_right, pltpu.roll(x_t, Lt - 1, 1))  # x[l+1]
        dw = x_t * w1 + x_lm1 * w0 + x_lp1 * w2 + db          # (C, Lt)

        # pointwise 1x1 conv
        w_pw = w_ref[...]                                     # (Cout, C)
        if C <= _VPU_POINTWISE_MAX_C:
            # tiny contraction: exact f32 FMAs on the VPU
            acc = w_pw[:, 0:1] * dw[0:1, :]
            for c in range(1, C):
                acc = acc + w_pw[:, c:c + 1] * dw[c:c + 1, :]
            pw = acc + pwb_ref[...]                           # (Cout, Lt)
        else:
            # MXU path, DEFAULT precision (per review), f32 accumulation
            pw = jnp.dot(w_pw, dw, preferred_element_type=jnp.float32) + pwb_ref[...]

        @pl.when(p == 0)
        def _stats_pass():
            @pl.when(li == 0)
            def _():
                sum_ref[...] = jnp.zeros_like(sum_ref)
                ssq_ref[...] = jnp.zeros_like(ssq_ref)

            if padded:
                pos = (li % n_seg) * Lt + lane                # position inside segment
                pw_v = jnp.where(pos < L, pw, 0.0)
            else:
                pw_v = pw
            sum_ref[...] += jnp.sum(pw_v, axis=1, keepdims=True)
            ssq_ref[...] += jnp.sum(pw_v * pw_v, axis=1, keepdims=True)

            @pl.when(li == n_tiles - 1)
            def _():
                mean = sum_ref[...] * inv_n
                var = jnp.maximum(ssq_ref[...] * inv_n - mean * mean, 0.0)
                inv_std = jax.lax.rsqrt(var + EPS)
                g, b = gb_ref[:, 0:1], gb_ref[:, 1:2]
                scale_ref[...] = g * inv_std
                shift_ref[...] = b - mean * (g * inv_std)

        @pl.when(p == 1)
        def _apply_pass():
            o_ref[...] = jnp.maximum(pw * scale_ref[...] + shift_ref[...], 0.0)

    vmem_bytes = int(min(max(est_bytes + (4 << 20), 16 << 20), 48 << 20))
    vmem_bytes = max(vmem_bytes, est_bytes + (1 << 20))

    out2 = pl.pallas_call(
        kernel,
        out_shape=jax.ShapeDtypeStruct((Cout, B * Lp), jnp.float32),
        grid=(2, n_tiles),
        in_specs=[
            pl.BlockSpec((C, Lt), lambda p, li: (0, li)),            # x (re-read pass 1)
            pl.BlockSpec((C, 4), lambda p, li: (0, 0)),              # depthwise taps+bias
            pl.BlockSpec((n_tiles, C, 2), lambda p, li: (0, 0, 0)),  # resident halo table
            pl.BlockSpec((Cout, C), lambda p, li: (0, 0)),           # pointwise weight
            pl.BlockSpec((Cout, 1), lambda p, li: (0, 0)),           # pointwise bias
            pl.BlockSpec((Cout, 2), lambda p, li: (0, 0)),           # gamma / beta
        ],
        # li*p parks the output block on block 0 during the stats pass so the
        # pre-BN activations never hit HBM; pass 1 writes each block once.
        out_specs=pl.BlockSpec((Cout, Lt), lambda p, li: (0, li * p)),
        scratch_shapes=[
            pltpu.VMEM((Cout, 1), jnp.float32),   # running sum
            pltpu.VMEM((Cout, 1), jnp.float32),   # running sum of squares
            pltpu.VMEM((Cout, 1), jnp.float32),   # BN scale = gamma * rsqrt(var+eps)
            pltpu.VMEM((Cout, 1), jnp.float32),   # BN shift = beta - mean * scale
        ],
        compiler_params=pltpu.CompilerParams(
            dimension_semantics=("arbitrary", "arbitrary"),
            vmem_limit_bytes=vmem_bytes),
    )(x2, dwp, edges, pww, pwb, gb)

    out = out2.reshape(Cout, B, Lp)[:, :, :L]
    return jnp.transpose(out, (1, 0, 2))


def reference(x, dw_w, dw_b, pw_w, pw_b, gamma, beta):
    """Pure-JAX reference matching the PyTorch forward (training-mode BN)."""
    B, C, H, W = x.shape
    L = H * W
    x3 = x.reshape(B, C, L).astype(jnp.float32)
    Cout = pw_w.shape[0]
    dw = jax.lax.conv_general_dilated(
        x3, dw_w, window_strides=(1,), padding=((1, 1),),
        dimension_numbers=("NCH", "OIH", "NCH"),
        feature_group_count=C) + dw_b.reshape(1, C, 1)
    pw = jax.lax.conv_general_dilated(
        dw, pw_w, window_strides=(1,), padding=((0, 0),),
        dimension_numbers=("NCH", "OIH", "NCH")) + pw_b.reshape(1, Cout, 1)
    mean = jnp.mean(pw, axis=(0, 2), keepdims=True)
    var = jnp.mean((pw - mean) ** 2, axis=(0, 2), keepdims=True)
    y = (pw - mean) / jnp.sqrt(var + EPS) * gamma.reshape(1, Cout, 1) \
        + beta.reshape(1, Cout, 1)
    return jnp.maximum(y, 0.0)


if __name__ == "__main__":
    key = jax.random.PRNGKey(0)
    kx, k1, k2, k3, k4, k5, k6 = jax.random.split(key, 7)

    B, Cin, H, W = 2, 4, 16, 16
    Cout = 8

    x = jax.random.normal(kx, (B, Cin, H, W), jnp.float32)
    # deterministic synthetic parameters (shapes match nn.Conv1d / BatchNorm1d)
    dw_w = 0.3 * jax.random.normal(k1, (Cin, 1, 3), jnp.float32)     # depthwise weight
    dw_b = 0.1 * jax.random.normal(k2, (Cin,), jnp.float32)          # depthwise bias
    pw_w = 0.3 * jax.random.normal(k3, (Cout, Cin, 1), jnp.float32)  # pointwise weight
    pw_b = 0.1 * jax.random.normal(k4, (Cout,), jnp.float32)         # pointwise bias
    gamma = 1.0 + 0.1 * jax.random.normal(k5, (Cout,), jnp.float32)  # BN weight
    beta = 0.1 * jax.random.normal(k6, (Cout,), jnp.float32)         # BN bias

    out = separable_conv2d(x, dw_w, dw_b, pw_w, pw_b, gamma, beta)
    out = jax.block_until_ready(out)

    ref = reference(x, dw_w, dw_b, pw_w, pw_b, gamma, beta)
    np.testing.assert_allclose(np.asarray(out), np.asarray(ref), rtol=1e-3, atol=1e-3)
    print("KERNEL_OK")
</pallas_src>

<mosaic_0001>
module attributes {stable_mosaic.version = 11 : i64} {
  func.func @kernel(%arg0: i32, %arg1: i32, %arg2: memref<4x256xf32, #tpu.memory_space<vmem>>, %arg3: memref<4x4xf32, #tpu.memory_space<vmem>>, %arg4: memref<2x4x2xf32, #tpu.memory_space<vmem>>, %arg5: memref<8x4xf32, #tpu.memory_space<vmem>>, %arg6: memref<8x1xf32, #tpu.memory_space<vmem>>, %arg7: memref<8x2xf32, #tpu.memory_space<vmem>>, %arg8: memref<8x256xf32, #tpu.memory_space<vmem>>, %arg9: memref<8x1xf32, #tpu.memory_space<vmem>>, %arg10: memref<8x1xf32, #tpu.memory_space<vmem>>, %arg11: memref<8x1xf32, #tpu.memory_space<vmem>>, %arg12: memref<8x1xf32, #tpu.memory_space<vmem>>) attributes {dimension_semantics = [#tpu.dimension_semantics<arbitrary>, #tpu.dimension_semantics<arbitrary>], iteration_bounds = array<i64: 2, 2>, scalar_prefetch = 0 : i64, scratch_operands = 4 : i64, tpu.core_type = #tpu.core_type<tc>, window_params = [{transform_indices = @transform_0, window_bounds = array<i64: 4, 256>}, {pipeline_mode = #tpu.pipeline_mode<synchronous>, transform_indices = @transform_1, window_bounds = array<i64: 4, 4>}, {pipeline_mode = #tpu.pipeline_mode<synchronous>, transform_indices = @transform_2, window_bounds = array<i64: 2, 4, 2>}, {pipeline_mode = #tpu.pipeline_mode<synchronous>, transform_indices = @transform_3, window_bounds = array<i64: 8, 4>}, {pipeline_mode = #tpu.pipeline_mode<synchronous>, transform_indices = @transform_4, window_bounds = array<i64: 8, 1>}, {pipeline_mode = #tpu.pipeline_mode<synchronous>, transform_indices = @transform_5, window_bounds = array<i64: 8, 2>}, {transform_indices = @transform_6, window_bounds = array<i64: 8, 256>}]} {
    %c0 = arith.constant 0 : index
    %c0_0 = arith.constant 0 : index
    %0 = vector.load %arg2[%c0, %c0_0] : memref<4x256xf32, #tpu.memory_space<vmem>>, vector<4x256xf32>
    %c0_1 = arith.constant 0 : index
    %c0_2 = arith.constant 0 : index
    %1 = vector.load %arg3[%c0_1, %c0_2] : memref<4x4xf32, #tpu.memory_space<vmem>>, vector<4x4xf32>
    %2 = vector.extract_strided_slice %1 {offsets = [0, 0], sizes = [4, 1], strides = [1, 1]} : vector<4x4xf32> to vector<4x1xf32>
    %3 = vector.extract_strided_slice %1 {offsets = [0, 1], sizes = [4, 1], strides = [1, 1]} : vector<4x4xf32> to vector<4x1xf32>
    %4 = vector.extract_strided_slice %1 {offsets = [0, 2], sizes = [4, 1], strides = [1, 1]} : vector<4x4xf32> to vector<4x1xf32>
    %5 = vector.extract_strided_slice %1 {offsets = [0, 3], sizes = [4, 1], strides = [1, 1]} : vector<4x4xf32> to vector<4x1xf32>
    %6 = arith.index_cast %arg1 : i32 to index
    %c0_3 = arith.constant 0 : index
    %c0_4 = arith.constant 0 : index
    %7 = vector.load %arg4[%6, %c0_3, %c0_4] : memref<2x4x2xf32, #tpu.memory_space<vmem>>, vector<1x4x2xf32>
    %8 = vector.shape_cast %7 : vector<1x4x2xf32> to vector<4x2xf32>
    %9 = vector.extract_strided_slice %8 {offsets = [0, 0], sizes = [4, 1], strides = [1, 1]} : vector<4x2xf32> to vector<4x1xf32>
    %10 = vector.extract_strided_slice %8 {offsets = [0, 1], sizes = [4, 1], strides = [1, 1]} : vector<4x2xf32> to vector<4x1xf32>
    %11 = tpu.iota {dimensions = array<i32: 1>} : vector<1x256xi32>
    %c0_i32 = arith.constant 0 : i32
    %12 = vector.broadcast %c0_i32 : i32 to vector<1x256xi32>
    %13 = arith.cmpi eq, %11, %12 : vector<1x256xi32>
    %c1_i32 = arith.constant 1 : i32
    %14 = tpu.dynamic_rotate %0 by %c1_i32 dim 1 : vector<4x256xf32>, i32 -> vector<4x256xf32>
    %15 = vector.shape_cast %13 : vector<1x256xi1> to vector<1x256xi1>
    %16 = vector.broadcast %15 : vector<1x256xi1> to vector<4x256xi1>
    %17 = vector.shape_cast %9 : vector<4x1xf32> to vector<4x1xf32>
    %18 = vector.broadcast %17 : vector<4x1xf32> to vector<4x256xf32>
    %19 = arith.select %16, %18, %14 : vector<4x256xi1>, vector<4x256xf32>
    %c255_i32 = arith.constant 255 : i32
    %20 = vector.broadcast %c255_i32 : i32 to vector<1x256xi32>
    %21 = arith.cmpi eq, %11, %20 : vector<1x256xi32>
    %c255_i32_5 = arith.constant 255 : i32
    %22 = tpu.dynamic_rotate %0 by %c255_i32_5 dim 1 : vector<4x256xf32>, i32 -> vector<4x256xf32>
    %23 = vector.shape_cast %21 : vector<1x256xi1> to vector<1x256xi1>
    %24 = vector.broadcast %23 : vector<1x256xi1> to vector<4x256xi1>
    %25 = vector.shape_cast %10 : vector<4x1xf32> to vector<4x1xf32>
    %26 = vector.broadcast %25 : vector<4x1xf32> to vector<4x256xf32>
    %27 = arith.select %24, %26, %22 : vector<4x256xi1>, vector<4x256xf32>
    %28 = vector.broadcast %3 : vector<4x1xf32> to vector<4x256xf32>
    %29 = arith.mulf %0, %28 : vector<4x256xf32>
    %30 = vector.broadcast %2 : vector<4x1xf32> to vector<4x256xf32>
    %31 = arith.mulf %19, %30 : vector<4x256xf32>
    %32 = arith.addf %29, %31 : vector<4x256xf32>
    %33 = vector.broadcast %4 : vector<4x1xf32> to vector<4x256xf32>
    %34 = arith.mulf %27, %33 : vector<4x256xf32>
    %35 = arith.addf %32, %34 : vector<4x256xf32>
    %36 = vector.broadcast %5 : vector<4x1xf32> to vector<4x256xf32>
    %37 = arith.addf %35, %36 : vector<4x256xf32>
    %c0_6 = arith.constant 0 : index
    %c0_7 = arith.constant 0 : index
    %38 = vector.load %arg5[%c0_6, %c0_7] : memref<8x4xf32, #tpu.memory_space<vmem>>, vector<8x4xf32>
    %39 = vector.extract_strided_slice %38 {offsets = [0, 0], sizes = [8, 1], strides = [1, 1]} : vector<8x4xf32> to vector<8x1xf32>
    %40 = vector.extract_strided_slice %37 {offsets = [0, 0], sizes = [1, 256], strides = [1, 1]} : vector<4x256xf32> to vector<1x256xf32>
    %41 = vector.broadcast %39 : vector<8x1xf32> to vector<8x256xf32>
    %42 = vector.broadcast %40 : vector<1x256xf32> to vector<8x256xf32>
    %43 = arith.mulf %41, %42 : vector<8x256xf32>
    %44 = vector.extract_strided_slice %38 {offsets = [0, 1], sizes = [8, 1], strides = [1, 1]} : vector<8x4xf32> to vector<8x1xf32>
    %45 = vector.extract_strided_slice %37 {offsets = [1, 0], sizes = [1, 256], strides = [1, 1]} : vector<4x256xf32> to vector<1x256xf32>
    %46 = vector.broadcast %44 : vector<8x1xf32> to vector<8x256xf32>
    %47 = vector.broadcast %45 : vector<1x256xf32> to vector<8x256xf32>
    %48 = arith.mulf %46, %47 : vector<8x256xf32>
    %49 = arith.addf %43, %48 : vector<8x256xf32>
    %50 = vector.extract_strided_slice %38 {offsets = [0, 2], sizes = [8, 1], strides = [1, 1]} : vector<8x4xf32> to vector<8x1xf32>
    %51 = vector.extract_strided_slice %37 {offsets = [2, 0], sizes = [1, 256], strides = [1, 1]} : vector<4x256xf32> to vector<1x256xf32>
    %52 = vector.broadcast %50 : vector<8x1xf32> to vector<8x256xf32>
    %53 = vector.broadcast %51 : vector<1x256xf32> to vector<8x256xf32>
    %54 = arith.mulf %52, %53 : vector<8x256xf32>
    %55 = arith.addf %49, %54 : vector<8x256xf32>
    %56 = vector.extract_strided_slice %38 {offsets = [0, 3], sizes = [8, 1], strides = [1, 1]} : vector<8x4xf32> to vector<8x1xf32>
    %57 = vector.extract_strided_slice %37 {offsets = [3, 0], sizes = [1, 256], strides = [1, 1]} : vector<4x256xf32> to vector<1x256xf32>
    %58 = vector.broadcast %56 : vector<8x1xf32> to vector<8x256xf32>
    %59 = vector.broadcast %57 : vector<1x256xf32> to vector<8x256xf32>
    %60 = arith.mulf %58, %59 : vector<8x256xf32>
    %61 = arith.addf %55, %60 : vector<8x256xf32>
    %c0_8 = arith.constant 0 : index
    %c0_9 = arith.constant 0 : index
    %62 = vector.load %arg6[%c0_8, %c0_9] : memref<8x1xf32, #tpu.memory_space<vmem>>, vector<8x1xf32>
    %63 = vector.broadcast %62 : vector<8x1xf32> to vector<8x256xf32>
    %64 = arith.addf %61, %63 : vector<8x256xf32>
    %c0_i32_10 = arith.constant 0 : i32
    %65 = arith.cmpi eq, %arg0, %c0_i32_10 : i32
    %66 = arith.extui %65 : i1 to i32
    %c0_i32_11 = arith.constant 0 : i32
    %67 = arith.cmpi ne, %66, %c0_i32_11 : i32
    scf.if %67 {
      %c0_i32_14 = arith.constant 0 : i32
      %71 = arith.cmpi eq, %arg1, %c0_i32_14 : i32
      %72 = arith.extui %71 : i1 to i32
      %c0_i32_15 = arith.constant 0 : i32
      %73 = arith.cmpi ne, %72, %c0_i32_15 : i32
      scf.if %73 {
        %cst_27 = arith.constant 0.000000e+00 : f32
        %88 = vector.broadcast %cst_27 : f32 to vector<8x1xf32>
        %c0_28 = arith.constant 0 : index
        %c0_29 = arith.constant 0 : index
        %89 = vector.load %arg9[%c0_28, %c0_29] : memref<8x1xf32, #tpu.memory_space<vmem>>, vector<8x1xf32>
        tpu.vector_store %arg9[%c0_28, %c0_29], %88 {strides = array<i32>} : memref<8x1xf32, #tpu.memory_space<vmem>>, vector<8x1xf32>,
        %cst_30 = arith.constant 0.000000e+00 : f32
        %90 = vector.broadcast %cst_30 : f32 to vector<8x1xf32>
        %c0_31 = arith.constant 0 : index
        %c0_32 = arith.constant 0 : index
        %91 = vector.load %arg10[%c0_31, %c0_32] : memref<8x1xf32, #tpu.memory_space<vmem>>, vector<8x1xf32>
        tpu.vector_store %arg10[%c0_31, %c0_32], %90 {strides = array<i32>} : memref<8x1xf32, #tpu.memory_space<vmem>>, vector<8x1xf32>,
      } else {
      }
      %c0_16 = arith.constant 0 : index
      %c0_17 = arith.constant 0 : index
      %74 = vector.load %arg9[%c0_16, %c0_17] : memref<8x1xf32, #tpu.memory_space<vmem>>, vector<8x1xf32>
      %cst = arith.constant dense<0.000000e+00> : vector<8xf32>
      %75 = vector.multi_reduction <add>, %64, %cst [1] : vector<8x256xf32> to vector<8xf32>
      %76 = vector.shape_cast %75 : vector<8xf32> to vector<8x1xf32>
      %77 = arith.addf %74, %76 : vector<8x1xf32>
      %c0_18 = arith.constant 0 : index
      %c0_19 = arith.constant 0 : index
      %78 = vector.load %arg9[%c0_18, %c0_19] : memref<8x1xf32, #tpu.memory_space<vmem>>, vector<8x1xf32>
      tpu.vector_store %arg9[%c0_18, %c0_19], %77 {strides = array<i32>} : memref<8x1xf32, #tpu.memory_space<vmem>>, vector<8x1xf32>,
      %c0_20 = arith.constant 0 : index
      %c0_21 = arith.constant 0 : index
      %79 = vector.load %arg10[%c0_20, %c0_21] : memref<8x1xf32, #tpu.memory_space<vmem>>, vector<8x1xf32>
      %80 = arith.mulf %64, %64 : vector<8x256xf32>
      %cst_22 = arith.constant dense<0.000000e+00> : vector<8xf32>
      %81 = vector.multi_reduction <add>, %80, %cst_22 [1] : vector<8x256xf32> to vector<8xf32>
      %82 = vector.shape_cast %81 : vector<8xf32> to vector<8x1xf32>
      %83 = arith.addf %79, %82 : vector<8x1xf32>
      %c0_23 = arith.constant 0 : index
      %c0_24 = arith.constant 0 : index
      %84 = vector.load %arg10[%c0_23, %c0_24] : memref<8x1xf32, #tpu.memory_space<vmem>>, vector<8x1xf32>
      tpu.vector_store %arg10[%c0_23, %c0_24], %83 {strides = array<i32>} : memref<8x1xf32, #tpu.memory_space<vmem>>, vector<8x1xf32>,
      %c1_i32_25 = arith.constant 1 : i32
      %85 = arith.cmpi eq, %arg1, %c1_i32_25 : i32
      %86 = arith.extui %85 : i1 to i32
      %c0_i32_26 = arith.constant 0 : i32
      %87 = arith.cmpi ne, %86, %c0_i32_26 : i32
      scf.if %87 {
        %c0_27 = arith.constant 0 : index
        %c0_28 = arith.constant 0 : index
        %88 = vector.load %arg9[%c0_27, %c0_28] : memref<8x1xf32, #tpu.memory_space<vmem>>, vector<8x1xf32>
        %cst_29 = arith.constant 0.001953125 : f32
        %89 = vector.broadcast %cst_29 : f32 to vector<8x1xf32>
        %90 = arith.mulf %88, %89 : vector<8x1xf32>
        %c0_30 = arith.constant 0 : index
        %c0_31 = arith.constant 0 : index
        %91 = vector.load %arg10[%c0_30, %c0_31] : memref<8x1xf32, #tpu.memory_space<vmem>>, vector<8x1xf32>
        %cst_32 = arith.constant 0.001953125 : f32
        %92 = vector.broadcast %cst_32 : f32 to vector<8x1xf32>
        %93 = arith.mulf %91, %92 : vector<8x1xf32>
        %94 = arith.mulf %90, %90 : vector<8x1xf32>
        %95 = arith.subf %93, %94 : vector<8x1xf32>
        %cst_33 = arith.constant 0.000000e+00 : f32
        %96 = vector.broadcast %cst_33 : f32 to vector<8x1xf32>
        %97 = arith.maximumf %95, %96 : vector<8x1xf32>
        %cst_34 = arith.constant 9.99999974E-6 : f32
        %98 = vector.broadcast %cst_34 : f32 to vector<8x1xf32>
        %99 = arith.addf %97, %98 : vector<8x1xf32>
        %100 = math.rsqrt %99 : vector<8x1xf32>
        %c0_35 = arith.constant 0 : index
        %c0_36 = arith.constant 0 : index
        %101 = vector.load %arg7[%c0_35, %c0_36] : memref<8x2xf32, #tpu.memory_space<vmem>>, vector<8x1xf32>
        %c0_37 = arith.constant 0 : index
        %c1 = arith.constant 1 : index
        %102 = vector.load %arg7[%c0_37, %c1] : memref<8x2xf32, #tpu.memory_space<vmem>>, vector<8x1xf32>
        %103 = arith.mulf %101, %100 : vector<8x1xf32>
        %c0_38 = arith.constant 0 : index
        %c0_39 = arith.constant 0 : index
        %104 = vector.load %arg11[%c0_38, %c0_39] : memref<8x1xf32, #tpu.memory_space<vmem>>, vector<8x1xf32>
        tpu.vector_store %arg11[%c0_38, %c0_39], %103 {strides = array<i32>} : memref<8x1xf32, #tpu.memory_space<vmem>>, vector<8x1xf32>,
        %105 = arith.mulf %101, %100 : vector<8x1xf32>
        %106 = arith.mulf %90, %105 : vector<8x1xf32>
        %107 = arith.subf %102, %106 : vector<8x1xf32>
        %c0_40 = arith.constant 0 : index
        %c0_41 = arith.constant 0 : index
        %108 = vector.load %arg12[%c0_40, %c0_41] : memref<8x1xf32, #tpu.memory_space<vmem>>, vector<8x1xf32>
        tpu.vector_store %arg12[%c0_40, %c0_41], %107 {strides = array<i32>} : memref<8x1xf32, #tpu.memory_space<vmem>>, vector<8x1xf32>,
      } else {
      }
    } else {
    }
    %c1_i32_12 = arith.constant 1 : i32
    %68 = arith.cmpi eq, %arg0, %c1_i32_12 : i32
    %69 = arith.extui %68 : i1 to i32
    %c0_i32_13 = arith.constant 0 : i32
    %70 = arith.cmpi ne, %69, %c0_i32_13 : i32
    scf.if %70 {
      %c0_14 = arith.constant 0 : index
      %c0_15 = arith.constant 0 : index
      %71 = vector.load %arg11[%c0_14, %c0_15] : memref<8x1xf32, #tpu.memory_space<vmem>>, vector<8x1xf32>
      %72 = vector.broadcast %71 : vector<8x1xf32> to vector<8x256xf32>
      %73 = arith.mulf %64, %72 : vector<8x256xf32>
      %c0_16 = arith.constant 0 : index
      %c0_17 = arith.constant 0 : index
      %74 = vector.load %arg12[%c0_16, %c0_17] : memref<8x1xf32, #tpu.memory_space<vmem>>, vector<8x1xf32>
      %75 = vector.broadcast %74 : vector<8x1xf32> to vector<8x256xf32>
      %76 = arith.addf %73, %75 : vector<8x256xf32>
      %cst = arith.constant 0.000000e+00 : f32
      %77 = vector.broadcast %cst : f32 to vector<8x256xf32>
      %78 = arith.maximumf %76, %77 : vector<8x256xf32>
      %c0_18 = arith.constant 0 : index
      %c0_19 = arith.constant 0 : index
      %79 = vector.load %arg8[%c0_18, %c0_19] : memref<8x256xf32, #tpu.memory_space<vmem>>, vector<8x256xf32>
      tpu.vector_store %arg8[%c0_18, %c0_19], %78 {strides = array<i32>} : memref<8x256xf32, #tpu.memory_space<vmem>>, vector<8x256xf32>,
    } else {
    }
    return
  }
  func.func @transform_0(%arg0: i32, %arg1: i32) -> (i32, i32) {
    %c0_i32 = arith.constant 0 : i32
    %c0_i32_0 = arith.constant 0 : i32
    return %c0_i32, %arg1 : i32, i32
  }
  func.func @transform_1(%arg0: i32, %arg1: i32) -> (i32, i32) {
    %c0_i32 = arith.constant 0 : i32
    %c0_i32_0 = arith.constant 0 : i32
    %c0_i32_1 = arith.constant 0 : i32
    return %c0_i32, %c0_i32_0 : i32, i32
  }
  func.func @transform_2(%arg0: i32, %arg1: i32) -> (i32, i32, i32) {
    %c0_i32 = arith.constant 0 : i32
    %c0_i32_0 = arith.constant 0 : i32
    %c0_i32_1 = arith.constant 0 : i32
    %c0_i32_2 = arith.constant 0 : i32
    return %c0_i32, %c0_i32_0, %c0_i32_1 : i32, i32, i32
  }
  func.func @transform_3(%arg0: i32, %arg1: i32) -> (i32, i32) {
    %c0_i32 = arith.constant 0 : i32
    %c0_i32_0 = arith.constant 0 : i32
    %c0_i32_1 = arith.constant 0 : i32
    return %c0_i32, %c0_i32_0 : i32, i32
  }
  func.func @transform_4(%arg0: i32, %arg1: i32) -> (i32, i32) {
    %c0_i32 = arith.constant 0 : i32
    %c0_i32_0 = arith.constant 0 : i32
    %c0_i32_1 = arith.constant 0 : i32
    return %c0_i32, %c0_i32_0 : i32, i32
  }
  func.func @transform_5(%arg0: i32, %arg1: i32) -> (i32, i32) {
    %c0_i32 = arith.constant 0 : i32
    %c0_i32_0 = arith.constant 0 : i32
    %c0_i32_1 = arith.constant 0 : i32
    return %c0_i32, %c0_i32_0 : i32, i32
  }
  func.func @transform_6(%arg0: i32, %arg1: i32) -> (i32, i32) {
    %0 = arith.muli %arg1, %arg0 : i32
    %c0_i32 = arith.constant 0 : i32
    %c0_i32_0 = arith.constant 0 : i32
    return %c0_i32, %0 : i32, i32
  }
}

</mosaic_0001>

<bundles_post_ra>
// kernel: separable_conv2d.1
= control target key start
LH: loop header
LB: loop body
LE: loop exit
PB: predicated region body
PF: predicated region fallthrough
CT: control target
= control target key end

     0   :  { %11 = vsyncpa [#allocation7], 0  ;;  %s1066_s0 = inlined_call_operand.vmem [shape: f32[4,512], index: 0, kind: input, shape index: {}]   ;;  %s1067_s1 = inlined_call_operand.vmem [shape: f32[4,4], index: 1, kind: input, shape index: {}]   ;;  %s1068_s2 = inlined_call_operand.vmem [shape: f32[2,4,2], index: 2, kind: input, shape index: {}]   ;;  %s1069_s3 = inlined_call_operand.vmem [shape: f32[8,4], index: 3, kind: input, shape index: {}]   ;;  %s1070_s4 = inlined_call_operand.vmem [shape: f32[8,1], index: 4, kind: input, shape index: {}]   ;;  %s1071_s5 = inlined_call_operand.vmem [shape: f32[8,2], index: 5, kind: input, shape index: {}]   ;;  %s1072_s6 = inlined_call_operand.hbm [shape: f32[8,512], index: 6, kind: output, shape index: {}]  }
   0x1   :  { %13 = vsyncpa [#allocation7 + $0x1], 0  ;;  %s903_s21 = smov 0   ;;  %s905_s22 = smov 0  }
   0x2   :  { %s907_s23 = smov 0   ;;  %s909_s24 = smov 0  }
   0x3   :  { %s911_s25 = smov 0   ;;  %s913_s26 = smov 0  }
   0x4   :  { %s915_s27 = smov 0   ;;  %s917_s28 = smov 0  }
   0x5 LB: > { %s643_s29 = sadd.s32 4294967295, %s854_s28   ;;  %s644_s30 = sadd.s32 4294967294, %s854_s28   ;;  %s854_s28 = sphi %s917_s28, %s19_s28   ;;  %s850_s27 = sphi %s915_s27, %s1081_s27   ;;  %s846_s26 = sphi %s913_s26, %s1080_s26   ;;  %s842_s25 = sphi %s911_s25, %s1079_s25   ;;  %s838_s24 = sphi %s909_s24, %s1078_s24   ;;  %s834_s23 = sphi %s907_s23, %s1077_s23   ;;  %s830_s22 = sphi %s905_s22, %s1076_s22   ;;  %s826_s21 = sphi %s903_s21, %s1075_s21  }
   0x6   : > { %s28_s7 = sadd.s32 1, %s846_s26  ;;  %s31_s8 = sadd.s32 1, %s850_s27 }
   0x7   : > { %p29_p0 = scmp.ge.s32.totalorder %s28_s7, 2  ;;  %s166_s9 = smul.u32 %s846_s26, %s850_s27 }
   0x8   : > { %p181_p1 = scmp.ne.s32.totalorder %s834_s23, %s830_s22  ;;  %p182_p2 = scmp.eq.s32.totalorder %s643_s29, 3 }
   0x9   : > { %s1083_s7 = smov (%p29_p0, %s28_s7), 0  ;;  %s1085_s8 = smov (!%p29_p0, %s31_s8), %s850_s27 }
   0xa   : > { %p187_p3 = scmp.ne.s32.totalorder %s830_s22, %s826_s21  ;;  %p33_p4 = scmp.ge.s32.totalorder %s1085_s8, 2 }
   0xb   : > { %p188_p5 = scmp.eq.s32.totalorder %s644_s30, 3  ;;  %p956_p6 = por %p182_p2, %p181_p1 }
   0xc   : > { %p647_p7 = scmp.ge.s32.totalorder %s854_s28, 1  ;;  %s1087_s8 = smov (%p33_p4, %s1085_s8), 0 }
   0xd   : > { %p963_p8 = por %p188_p5, %p187_p3  ;;  %p230_p9 = scmp.lt.s32.totalorder %s854_s28, 5 }
   0xe   : > { %s167_s12 = smul.u32 %s1087_s8, %s1083_s7  ;;  %s171_s14 = sadd.s32 1, %s834_s23 }
   0xf   : > { %p231_p10 = pnand %p647_p7, %p230_p9 }
  0x10   : > { %s168_s13 = ssub.s32 %s166_s9, %s167_s12  ;;  %v269_v0 = vld [vmem:[%s1067_s1] sm:$0xf] (!%p231_p10)  ;;  %s651_s18 = sshll.u32 (!%p231_p10), %s838_s24, 2  ;;  %v856_v1 = vmov (!%p231_p10), 0   ;;  %v857_v3 = vmov (!%p231_p10), 1   ;;  %v858_v5 = vmov (!%p231_p10), 2   ;;  %v273_v12 = vlaneseq (!%p231_p10) }
  0x11   : > { %p169_p11 = scmp.eq.s32.totalorder %s168_s13, 0  ;;  %234 = sbr.rel (%p231_p10) target bundleno = 777 (0x309), region = 44  ;;  %746 = vset.pattern.permute.xlu1 (!%p231_p10), %v856_v1  ;;  %744 = vset.pattern.permute.xlu0 (!%p231_p10), %v856_v1  ;;  %v860_v7 = vmov (!%p231_p10), 3   ;;  %v365_v8 = vld [vmem:[%s1069_s3] sm:$0xff] (!%p231_p10)  ;;  %v862_v14 = vmov (!%p231_p10), 839922192  }
  0x12   : > { %s271_s29 = scalar_lea.vmem (!%p231_p10), %s1068_s2, %s651_s18  ;;  %s649_s30 = sshll.u32 (!%p231_p10), %s838_s24, 1  ;;  %332 = vperm.xlu1 (!%p231_p10), %746, %v269_v0   ;;  %v470_v9 = vld [vmem:[%s1070_s4] sm:$0xff] (!%p231_p10)  ;;  %v323_v15 = vunpack.c.l.s4 (!%p231_p10), %v862_v14  ;;  %v274_v17 = vand.u32 (!%p231_p10), 127, %v273_v12  ;;  %v326_v20 = vshrl.u32 (!%p231_p10), %v273_v12, 7 }
  0x13   : > { %s972_s15 = scalar_select %p169_p11, %s834_s23, %s171_s14  }
  0x14   : > { %v272_v2 = vld [vmem:[%s271_s29] sm:$0xf] (!%p231_p10)  ;;  %p261_p12 = scmp.lt.s32.totalorder (!%p231_p10), %s649_s30, 3  ;;  %s859_s16 = smov (!%p231_p10), 1   ;;  %v324_v19 = vunpack.c.0.s8 (!%p231_p10), %v323_v15  ;;  %vm285_vm0 = vcmp.lt.s32.totalorder (!%p231_p10), %v274_v17, 1  ;;  %vm276_vm1 = vcmp.eq.s32.totalorder (!%p231_p10), %v274_v17, 0 }
  0x15   : > { %294 = vperm.xlu0 (!%p231_p10), %744, %v272_v2   ;;  %s861_s19 = smov (!%p231_p10), 127   ;;  %v275_v27 = vadd.s32 (!%p231_p10), 128, %v274_v17  ;;  %vm305_vm2 = vcmp.lt.s32.totalorder (!%p231_p10), %v274_v17, 127  ;;  %v374_v44 = vsub.s32 (!%p231_p10), 0, %v326_v20  ;;  %v378_v46 = vsub.s32 (!%p231_p10), 4, %v326_v20  ;;  %p652_p13 = scmp.ne.s32.totalorder (!%p231_p10), %s842_s25, 0 }
  0x16   : > { %747 = vset.pattern.permute.xlu1 (!%p231_p10), %v857_v3  ;;  %v327_v23 = vsub.s32 (!%p231_p10), %v324_v19, %v326_v20  ;;  %v398_v47 = vsub.s32 (!%p231_p10), 1, %v326_v20  ;;  %v402_v48 = vsub.s32 (!%p231_p10), 5, %v326_v20  ;;  %v450_v50 = vsub.s32 (!%p231_p10), 3, %v326_v20 }
  0x17   : > { %313 = vperm.xlu1 (!%p231_p10), %747, %v272_v2   ;;  %vm300_vm3 = vcmp.eq.s32.totalorder (!%p231_p10), %v275_v27, 255  ;;  %v454_v51 = vsub.s32 (!%p231_p10), 7, %v326_v20  ;;  %v424_v52 = vsub.s32 (!%p231_p10), 2, %v326_v20  ;;  %v428_v53 = vsub.s32 (!%p231_p10), 6, %v326_v20 }
  0x18   : > { %s1089_s30 = smov (!%p261_p12, %s649_s30), 3  ;;  %p653_p0 = scmp.ne.s32.totalorder (!%p652_p13), %s838_s24, 0 }
  0x19   : > { %s650_s9 = sshll.u32 %s1089_s30, 2  ;;  %745 = vset.pattern.permute.xlu0 %v857_v3  ;;  %s257_s30 = sand.u32 1, %s830_s22  }
  0x1a   : > { %s264_s14 = scalar_lea.vmem %s1066_s0, %s650_s9  ;;  %320 = vperm.xlu0 %745, %v269_v0   ;;  %s994_s9 = sshll.u32 %s257_s30, 4 }
  0x1b   : > { %v268_v4 = vld [vmem:[%s264_s14] sm:$0xff]  ;;  %748 = vset.pattern.permute.xlu1 %v858_v5  ;;  %s997_s12 = scalar_lea.vmem [#allocation6], %s994_s9 }
  0x1c   : > { %343 = vperm.xlu1 %748, %v269_v0   ;;  %v279_v6 = vcombine.high %v268_v4, %v268_v4 }
  0x1e   : > { %281 = vrot.lane.b32.xlu0 %v268_v4, %s859_s16 }
  0x1f   : > { %749 = vset.pattern.permute.xlu0 %v860_v7 }
  0x20   : > { %283 = vrot.lane.b32.xlu1 %v279_v6, %s859_s16 }
  0x21   : > { %751 = vset.pattern.permute.xlu1 %v857_v3 }
  0x22   : > { %354 = vperm.xlu0 %749, %v269_v0  }
  0x24   : > { %301 = vrot.lane.b32.xlu1 %v268_v4, %s861_s19 }
  0x26   : > { %750 = vset.pattern.permute.xlu0 %v856_v1 }
  0x27   : > { %368 = vperm.xlu0 %750, %v365_v8  }
  0x28   : > { %303 = vrot.lane.b32.xlu1 %v279_v6, %s861_s19 }
  0x2b   : > { %753 = vset.pattern.permute.xlu0 %v860_v7 }
  0x2c   : > { %445 = vperm.xlu0 %753, %v365_v8   ;;  %393 = vperm.xlu1 %751, %v365_v8  }
  0x30   : > { %755 = vset.pattern.permute.xlu0 %v856_v1  ;;  %752 = vset.pattern.permute.xlu1 %v858_v5 }
  0x31   : > { %419 = vperm.xlu1 %752, %v365_v8  }
  0x35   : > { %754 = vset.pattern.permute.xlu1 %v856_v1 }
  0x36   : > { %473 = vperm.xlu1 %754, %v470_v9  }
  0x91   : > { %v333_v10 = vpop.permute.xlu1 %332 }
  0x94   : > { %v295_v11 = vpop.permute.xlu0 %294 }
  0x96   : > { %v314_v13 = vpop.permute.xlu1 %313 }
  0x99   : > { %v321_v16 = vpop.permute.xlu0 %320 }
  0x9a   : > { %v328_v29 = vrot.slane %v321_v16, %v327_v23 }
  0x9b   : > { %v344_v18 = vpop.permute.xlu1 %343 }
  0x9c   : > { %v330_v33 = vmul.f32 %v328_v29, %v268_v4 }
  0x9d   : > { %v282_v21 = vpop.permute.xlu0 %281 }
  0x9f   : > { %v284_v22 = vpop.permute.xlu1 %283 }
  0xa0   : > { %v287_v24 = vsel %vm285_vm0, %v284_v22, %v282_v21  ;;  %v286_v25 = vsel %vm285_vm0, %v282_v21, %v284_v22 }
  0xa1   : > { %v297_v26 = vsel %vm276_vm1, %v295_v11, %v287_v24  ;;  %v336_v31 = vmul.f32 %v333_v10, %v286_v25  ;;  %v355_v39 = vpop.permute.xlu0 %354 }
  0xa2   : > { %v335_v30 = vmul.f32 %v333_v10, %v297_v26  ;;  %v362_v43 = vrot.slane %v355_v39, %v327_v23 }
  0xa3   : > { %v302_v28 = vpop.permute.xlu1 %301 }
  0xa4   : > { %v339_v34 = vcombine.low %v335_v30, %v336_v31 }
  0xa6   : > { %v341_v42 = vadd.f32 %v339_v34, %v330_v33  ;;  %v369_v55 = vpop.permute.xlu0 %368 }
  0xa7   : > { %v304_v32 = vpop.permute.xlu1 %303 }
  0xa8   : > { %v306_v35 = vsel %vm305_vm2, %v302_v28, %v304_v32  ;;  %v307_v36 = vsel %vm305_vm2, %v304_v32, %v302_v28 }
  0xa9   : > { %v317_v37 = vsel %vm300_vm3, %v314_v13, %v307_v36  ;;  %v346_v38 = vmul.f32 %v344_v18, %v306_v35 }
  0xaa   : > { %v347_v40 = vmul.f32 %v344_v18, %v317_v37 }
  0xab   : > { %v394_v49 = vpop.permute.xlu1 %393  ;;  %v446_v13 = vpop.permute.xlu0 %445 }
  0xac   : > { %v350_v41 = vcombine.low %v346_v38, %v347_v40 }
  0xae   : > { %v352_v45 = vadd.f32 %v350_v41, %v341_v42 }
  0xb0   : > { %v364_v54 = vadd.f32 %v362_v43, %v352_v45  ;;  %v420_v8 = vpop.permute.xlu1 %419 }
  0xb2   : > { %v375_v56 = vrot.slane %v364_v54, %v374_v44  ;;  %v379_v57 = vrot.slane %v364_v54, %v378_v46  ;;  %v399_v58 = vrot.slane %v364_v54, %v398_v47  ;;  %v403_v59 = vrot.slane %v364_v54, %v402_v48 }
  0xb3   : > { %v451_v60 = vrot.slane %v364_v54, %v450_v50  ;;  %v455_v61 = vrot.slane %v364_v54, %v454_v51  ;;  %v425_v62 = vrot.slane %v364_v54, %v424_v52  ;;  %v429_v63 = vrot.slane %v364_v54, %v428_v53 }
  0xb4   : > { %v385_v0 = vrot.slane %v375_v56, %v374_v44  ;;  %v389_v1 = vrot.slane %v379_v57, %v374_v44  ;;  %v409_v2 = vrot.slane %v399_v58, %v398_v47  ;;  %v413_v3 = vrot.slane %v403_v59, %v398_v47 }
  0xb5   : > { %v461_v4 = vrot.slane %v451_v60, %v450_v50  ;;  %v465_v5 = vrot.slane %v455_v61, %v450_v50  ;;  %v435_v6 = vrot.slane %v425_v62, %v424_v52  ;;  %v439_v7 = vrot.slane %v429_v63, %v424_v52  ;;  %v474_v22 = vpop.permute.xlu1 %473 }
  0xb6   : > { %v390_v9 = vmul.f32 %v385_v0, %v369_v55  ;;  %v391_v10 = vmul.f32 %v389_v1, %v369_v55  ;;  %v414_v11 = vmul.f32 %v409_v2, %v394_v49  ;;  %v415_v12 = vmul.f32 %v413_v3, %v394_v49 }
  0xb7   : > { %v440_v16 = vmul.f32 %v435_v6, %v420_v8  ;;  %v441_v17 = vmul.f32 %v439_v7, %v420_v8  ;;  %v466_v18 = vmul.f32 %v461_v4, %v446_v13  ;;  %v467_v19 = vmul.f32 %v465_v5, %v446_v13 }
  0xb8   : > { %v416_v14 = vadd.f32 %v414_v11, %v390_v9  ;;  %v417_v15 = vadd.f32 %v415_v12, %v391_v10  ;;  %481 = sbr.rel (%p652_p13) target bundleno = 612 (0x264), region = 48 }
  0xba   : > { %v442_v20 = vadd.f32 %v440_v16, %v416_v14  ;;  %v443_v21 = vadd.f32 %v441_v17, %v417_v15 }
  0xbc   : > { %v468_v23 = vadd.f32 %v466_v18, %v442_v20  ;;  %v469_v24 = vadd.f32 %v467_v19, %v443_v21 }
  0xbe   : > { %v476_v25 = vadd.f32 %v474_v22, %v468_v23  ;;  %v477_v26 = vadd.f32 %v474_v22, %v469_v24 }
  0xbf   : > { %485 = sbr.rel (%p653_p0) target bundleno = 198 (0xc6), region = 52  ;;  %vm486_vm4 = vcmask (!%p653_p0), 7168   ;;  %v863_v27 = vmov (!%p653_p0), 0.0  }
  0xc0   : > { %487 = vst.msk [vmem:[#allocation2] sm:$0xff] (!%p653_p0), %vm486_vm4, %v863_v27  ;;  %488 = vst.msk [vmem:[#allocation3] sm:$0xff] (!%p653_p0), %vm486_vm4, %v863_v27 }
  0xc6 PF: > { %v490_v28 = vadd.f32 %v477_v26, %v476_v25  ;;  %v497_v29 = vmul.f32 %v476_v25, %v476_v25  ;;  %v498_v30 = vmul.f32 %v477_v26, %v477_v26  ;;  %vm494_vm5 = vcmask 7168   ;;  %p654_p1 = scmp.ne.s32.totalorder %s838_s24, 1 }
  0xc7   : > { %v489_v32 = vld [vmem:[#allocation2] sm:$0xff]  ;;  %v496_v35 = vld [vmem:[#allocation3] sm:$0xff]  ;;  %s864_s16 = smov (!%p654_p1), 1   ;;  %s865_s17 = smov (!%p654_p1), 127  }
  0xc8   : > { %491 = vadd.xlane.f32.xlu0 %v490_v28  ;;  %v499_v31 = vadd.f32 %v498_v30, %v497_v29  ;;  %v517_v46 = vld [vmem:[%s1071_s5] sm:$0xff] (!%p654_p1) }
  0xcc   : > { %500 = vadd.xlane.f32.xlu0 %v499_v31 }
 0x155   : > { %v492_v33 = vpop.xlane.xlu0 %491 }
 0x156   : > { %v493_v34 = vadd.f32 %v492_v33, %v489_v32  ;;  %507 = sbr.rel (%p654_p1) target bundleno = 612 (0x264), region = 56 }
 0x158   : > { %495 = vst.msk [vmem:[#allocation2] sm:$0xff] %vm494_vm5, %v493_v34 }
 0x159   : > { %v501_v36 = vpop.xlane.xlu0 %500 }
 0x15a   : > { %v502_v37 = vadd.f32 %v501_v36, %v496_v35 }
 0x15c   : > { %503 = vst.msk [vmem:[#allocation3] sm:$0xff] %vm494_vm5, %v502_v37 }
 0x15f   : > { %v508_v38 = vld [vmem:[#allocation2] sm:$0xff] }
 0x160   : > { %v509_v40 = vmul.f32 0.001953125, %v508_v38 }
 0x162   : > { %v512_v42 = vmul.f32 %v509_v40, %v509_v40 }
 0x163   : > { %v510_v39 = vld [vmem:[#allocation3] sm:$0xff] }
 0x164   : > { %v511_v41 = vmul.f32 0.001953125, %v510_v39 }
 0x166   : > { %v513_v43 = vsub.f32 %v511_v41, %v512_v42 }
 0x168   : > { %v514_v44 = vmax.f32 %v513_v43, 0.0 }
 0x16a   : > { %v515_v45 = vadd.f32 1e-05, %v514_v44 }
 0x16c   : > { %757 = vrsqrt.f32 %v515_v45 }
 0x176   : > { %v758_v47 = vpop.eup %757 }
 0x177   : > { %v518_v48 = vmul.f32 %v758_v47, %v517_v46 }
 0x179   : > { %v520_v49 = vmul.f32 %v518_v48, %v509_v40  ;;  %519 = vst.msk [vmem:[#allocation4] sm:$0xff] %vm494_vm5, %v518_v48 }
 0x17b   : > { %522 = vrot.lane.b32.xlu0 %v520_v49, %s864_s16 }
 0x1ed   : > { %v523_v50 = vpop.permute.xlu0 %522 }
 0x1ee   : > { %v525_v51 = vsub.f32 %v517_v46, %v523_v50 }
 0x1f0   : > { %527 = vrot.lane.b32.xlu0 %v525_v51, %s865_s17 }
 0x262   : > { %v528_v52 = vpop.permute.xlu0 %527 }
 0x263   : > { %530 = vst.msk [vmem:[#allocation5] sm:$0xff] %vm494_vm5, %v528_v52 }
 0x264 PF: > { %p655_p2 = scmp.ne.s32.totalorder %s842_s25, 1 }
 0x265   : > { %v535_v53 = vld [vmem:[#allocation4] sm:$0xff] (!%p655_p2)  ;;  %v866_v54 = vmov (!%p655_p2), 0  }
 0x266   : > { %534 = sbr.rel (%p655_p2) target bundleno = 752 (0x2f0), region = 60  ;;  %759 = vset.pattern.permute.xlu0 (!%p655_p2), %v866_v54 }
 0x267   : > { %538 = vperm.xlu0 (!%p655_p2), %759, %v535_v53  }
 0x26a   : > { %v543_v55 = vld [vmem:[#allocation5] sm:$0xff] (!%p655_p2) }
 0x26b   : > { %546 = vperm.xlu0 (!%p655_p2), %759, %v543_v55  }
 0x2e6   : > { %v539_v56 = vpop.permute.xlu0 %538 }
 0x2e7   : > { %v541_v57 = vmul.f32 %v539_v56, %v476_v25  ;;  %v542_v58 = vmul.f32 %v539_v56, %v477_v26 }
 0x2ea   : > { %v547_v59 = vpop.permute.xlu0 %546 }
 0x2eb   : > { %v549_v60 = vadd.f32 %v547_v59, %v541_v57  ;;  %v550_v61 = vadd.f32 %v547_v59, %v542_v58 }
 0x2ed   : > { %v551_v62 = vmax.f32 %v549_v60, 0.0  ;;  %v552_v63 = vmax.f32 %v550_v61, 0.0 }
 0x2ef   : > { %553 = vst [vmem:[%s997_s12] sm:$0xff] %v551_v62  ;;  %554 = vst [vmem:[%s997_s12 + $0x8] sm:$0xff] %v552_v63 }
 0x2f0 PF: > { %s563_s18 = smul.u32 %s838_s24, %s842_s25  ;;  %s571_s19 = sshll.u32 %s997_s12, 4  ;;  %s1015_s19 = int_to_ptr.vmem [resolvable:$true] %s571_s19 }
 0x2f1   : > { %s556_s14 = scalar_lea.sflag [#allocation7], %s257_s30  ;;  %s760_s16 = scalar_lea.vmem %s1015_s19, 256 }
 0x2f2   : > { %s661_s20 = sshll.u32 %s563_s18, 8  ;;  %p761_p3 = scmp.ne.s32.totalorder %s1015_s19, %s760_s16 }
 0x2f3   : > { %s569_s13 = scalar_lea.hbm %s1072_s6, %s661_s20  ;;  %s867_s17 = smov [#allocation6]  }
 0x2f4   : > { %p762_p4 = pnand %p761_p3, %p956_p6  ;;  %s764_s24 = sshll.u32 %s867_s17, 4  ;;  %s765_s24 = int_to_ptr.vmem [resolvable:$false] %s764_s24 }
 0x2f5   : > { %s766_s25 = scalar_lea.vmem %s765_s24, 512  ;;  %p767_p7 = scmp.lt.s32.totalorder %s1015_s19, %s765_s24 }
 0x2f6   : > { %p763_p5 = pneg %p762_p4  ;;  %p768_p9 = scmp.lt.s32.totalorder %s766_s25, %s760_s16 }
 0x2f8   : > { %p769_p10 = por %p768_p9, %p767_p7 }
 0x2fa   : > { %p770_p11 = pnand %p769_p10, %p763_p5 }
 0x2fc   : > { %773 = shalt.err (!%p770_p11)
}
 0x2fd   : > { %s774_s12 = scalar_lea.hbm %s569_s13, 256  ;;  %s778_s20 = scalar_lea.hbm %s1072_s6, 512 }
 0x2fe   : > { %p775_p12 = scmp.ne.s32.totalorder %s569_s13, %s774_s12  ;;  %p779_p1 = scmp.lt.u32.totalorder %s569_s13, %s1072_s6 }
 0x2ff   : > { %p780_p2 = scmp.lt.u32.totalorder %s778_s20, %s774_s12  ;;  %p782_p4 = scmp.lt.u32.totalorder %s774_s12, %s569_s13 }
 0x300   : > { %p776_p13 = pnand %p775_p12, %p956_p6 }
 0x301   : > { %p781_p3 = por %p780_p2, %p779_p1 }
 0x302   : > { %p777_p0 = pneg %p776_p13 }
 0x303   : > { %p783_p7 = por %p782_p4, %p781_p3 }
 0x305   : > { %p784_p5 = pnand %p783_p7, %p777_p0 }
 0x307   : > { %787 = shalt.err (!%p784_p5)
}
 0x308   : > { %662 = dma.vmem_to_hbm [thread:$0]  (%p956_p6), %s1015_s19, 256, %s569_s13, %s556_s14  }
 0x309 PF: > { %p668_p9 = scmp.ge.s32.totalorder %s854_s28, 2  ;;  %s583_s16 = sand.u32 1, %s826_s21  }
 0x30a   : > { %s584_s17 = scalar_lea.sflag [#allocation7], %s583_s16 }
 0x30b   : > { %p665_p10 = pnand %p668_p9, %p963_p8 }
 0x30d   : > { %821 = dma.done.wait (!%p665_p10), %s584_s17, 256  }
 0x30e   : > { %823 = vsyncadd (!%p665_p10), %s584_s17, 4294967040  ;;  %s19_s28 = sadd.s32 1, %s854_s28   ;;  %s1075_s21 = smov %s830_s22 }
 0x30f   : > { %p16_p11 = scmp.ge.s32.totalorder %s19_s28, 6   ;;  %s1076_s22 = smov %s834_s23 }
 0x310   : > { %s1077_s23 = smov %s972_s15  ;;  %s1078_s24 = smov %s846_s26 }
 0x311   : > { %s1079_s25 = smov %s850_s27  ;;  %s1080_s26 = smov %s1083_s7 }
 0x312   : > { %s1081_s27 = smov %s1087_s8  ;;  %18 = sbr.rel (!%p16_p11) target bundleno = 5 (0x5), region = 96 }
 0x319   :  { %589 = vsyncpa [#allocation7], 1 }
 0x31a   :  { %591 = vsyncpa [#allocation7 + $0x1], 1 }

</bundles_post_ra>
